<compile_context>
chip_gen: v7x
topology: tpu7x:2x2x1
jax: 0.10.0
libtpu: 0.0.40
codegen_flags: <defaults>
</compile_context>

<pallas_src>
import math

import jax
import jax.numpy as jnp
from jax.experimental import pallas as pl
from jax.experimental.pallas import tpu as pltpu


def _round_up(x, m):
    return ((x + m - 1) // m) * m


def _make_mlp_kernel(num_layers, use_bf16_mxu):
    """Kernel body: fused Linear(+bias) / Tanh stack over one row tile."""

    def kernel(x_ref, *refs):
        out_ref = refs[-1]
        params = refs[:-1]  # (w0, b0, w1, b1, ...)
        h = x_ref[...].astype(jnp.float32)  # (TM, d0)
        for i in range(num_layers):
            w = params[2 * i][...]
            b = params[2 * i + 1][...].astype(jnp.float32)  # (1, d_{i+1})
            if use_bf16_mxu:
                lhs = h.astype(jnp.bfloat16)
                rhs = w.astype(jnp.bfloat16)
            else:
                lhs = h
                rhs = w.astype(jnp.float32)
            h = jnp.dot(lhs, rhs, preferred_element_type=jnp.float32) + b  # MXU
            if i < num_layers - 1:
                h = jnp.tanh(h)  # EUP, f32
        out_ref[...] = h.astype(out_ref.dtype)

    return kernel


def cell_embed(x, weights, biases, *, tm=256, use_bf16_mxu=False):
    """Pallas implementation of CellEmbed.forward.

    x        : (..., d0) float32, d0 = number of genes
    weights  : list of (d_i, d_{i+1}) matrices
    biases   : list of (d_{i+1},) vectors
    returns  : (..., d_L)
    """
    assert len(weights) == len(biases) and len(weights) >= 1
    lead_shape = x.shape[:-1]
    d0 = x.shape[-1]
    assert weights[0].shape[0] == d0, "first layer in-dim must equal number of genes"
    num_layers = len(weights)
    d_out = weights[-1].shape[1]

    # ---- flatten leading dims to a single row axis ----------------------------------
    rows = int(math.prod(lead_shape)) if lead_shape else 1
    x2 = x.reshape(rows, d0)

    # ---- lane-dense output: pad final feature dim to a multiple of 128 --------------
    d_out_p = _round_up(d_out, 128)
    ws = list(weights)
    bs = list(biases)
    if d_out_p != d_out:
        ws[-1] = jnp.pad(ws[-1], ((0, 0), (0, d_out_p - d_out)))
        bs[-1] = jnp.pad(bs[-1], (0, d_out_p - d_out))
    bs = [b.reshape(1, -1) for b in bs]  # 2-D for VMEM

    # ---- row tiling ------------------------------------------------------------------
    tm_eff = _round_up(min(tm, _round_up(rows, 8)), 8)
    rows_p = _round_up(rows, tm_eff)
    if rows_p != rows:
        x2 = jnp.pad(x2, ((0, rows_p - rows), (0, 0)))

    grid = (rows_p // tm_eff,)

    in_specs = [pl.BlockSpec((tm_eff, d0), lambda r: (r, 0))]
    args = [x2]
    for w, b in zip(ws, bs):
        in_specs.append(pl.BlockSpec(w.shape, lambda r: (0, 0)))  # resident weight
        in_specs.append(pl.BlockSpec(b.shape, lambda r: (0, 0)))  # resident bias
        args.append(w)
        args.append(b)

    out = pl.pallas_call(
        _make_mlp_kernel(num_layers, use_bf16_mxu),
        out_shape=jax.ShapeDtypeStruct((rows_p, d_out_p), x.dtype),
        grid_spec=pltpu.PrefetchScalarGridSpec(
            num_scalar_prefetch=0,
            grid=grid,
            in_specs=in_specs,
            out_specs=pl.BlockSpec((tm_eff, d_out_p), lambda r: (r, 0)),
        ),
        compiler_params=pltpu.CompilerParams(
            dimension_semantics=("parallel",),  # row tiles are independent (megacore)
        ),
    )(*args)

    out = out[:rows, :d_out]
    return out.reshape(*lead_shape, d_out)


def cell_embed_ref(x, weights, biases):
    """Pure-JAX reference mirroring the PyTorch forward."""
    h = x
    num_layers = len(weights)
    for i, (w, b) in enumerate(zip(weights, biases)):
        h = h @ w + b
        if i < num_layers - 1:
            h = jnp.tanh(h)
    return h


if __name__ == "__main__":
    key = jax.random.PRNGKey(0)

    # d = [genes, hidden, embedding]  (matches CellEmbed(d) layer list)
    d = [32, 64, 16]
    B, N = 2, 16  # batch, cells

    n_layers = len(d) - 1
    keys = jax.random.split(key, 1 + 2 * n_layers)
    x = jax.random.normal(keys[0], (B, N, d[0]), dtype=jnp.float32)

    weights, biases = [], []
    for i in range(n_layers):
        bound = 1.0 / math.sqrt(d[i])  # nn.Linear default init range
        weights.append(
            jax.random.uniform(keys[1 + 2 * i], (d[i], d[i + 1]), jnp.float32, -bound, bound)
        )
        biases.append(
            jax.random.uniform(keys[2 + 2 * i], (d[i + 1],), jnp.float32, -bound, bound)
        )

    ref = cell_embed_ref(x, weights, biases)

    # f32 MXU path
    out = cell_embed(x, weights, biases)
    jax.block_until_ready(out)
    assert out.shape == (B, N, d[-1])
    assert jnp.allclose(out, ref, atol=1e-2, rtol=1e-2), "f32 kernel mismatch vs reference"

    # bf16-operand MXU path (f32 accumulation) — relaxed tolerance
    out_bf16 = cell_embed(x, weights, biases, use_bf16_mxu=True)
    jax.block_until_ready(out_bf16)
    assert jnp.allclose(out_bf16, ref, atol=3e-2, rtol=3e-2), "bf16 kernel mismatch vs reference"

    print("KERNEL_OK")
</pallas_src>

<mosaic_0001>
module attributes {stable_mosaic.version = 11 : i64} {
  func.func @kernel(%arg0: i32, %arg1: memref<32x32xf32, #tpu.memory_space<vmem>>, %arg2: memref<32x64xf32, #tpu.memory_space<vmem>>, %arg3: memref<1x64xf32, #tpu.memory_space<vmem>>, %arg4: memref<64x128xf32, #tpu.memory_space<vmem>>, %arg5: memref<1x128xf32, #tpu.memory_space<vmem>>, %arg6: memref<32x128xf32, #tpu.memory_space<vmem>>) attributes {dimension_semantics = [#tpu.dimension_semantics<parallel>], iteration_bounds = array<i64: 1>, scalar_prefetch = 0 : i64, scratch_operands = 0 : i64, tpu.core_type = #tpu.core_type<tc>, window_params = [{transform_indices = @transform_0, window_bounds = array<i64: 32, 32>}, {pipeline_mode = #tpu.pipeline_mode<synchronous>, transform_indices = @transform_1, window_bounds = array<i64: 32, 64>}, {pipeline_mode = #tpu.pipeline_mode<synchronous>, transform_indices = @transform_2, window_bounds = array<i64: 1, 64>}, {pipeline_mode = #tpu.pipeline_mode<synchronous>, transform_indices = @transform_3, window_bounds = array<i64: 64, 128>}, {pipeline_mode = #tpu.pipeline_mode<synchronous>, transform_indices = @transform_4, window_bounds = array<i64: 1, 128>}, {transform_indices = @transform_5, window_bounds = array<i64: 32, 128>}]} {
    %c0 = arith.constant 0 : index
    %c0_0 = arith.constant 0 : index
    %0 = vector.load %arg1[%c0, %c0_0] : memref<32x32xf32, #tpu.memory_space<vmem>>, vector<32x32xf32>
    %c0_1 = arith.constant 0 : index
    %c0_2 = arith.constant 0 : index
    %1 = vector.load %arg2[%c0_1, %c0_2] : memref<32x64xf32, #tpu.memory_space<vmem>>, vector<32x64xf32>
    %c0_3 = arith.constant 0 : index
    %c0_4 = arith.constant 0 : index
    %2 = vector.load %arg3[%c0_3, %c0_4] : memref<1x64xf32, #tpu.memory_space<vmem>>, vector<1x64xf32>
    %cst = arith.constant dense<0.000000e+00> : vector<32x64xf32>
    %3 = tpu.matmul %0, %1, %cst {dimension_numbers = #tpu.dot_dimension_numbers<[1], [0], [0], [1], [0, 0, 1, 1], [], []>} : vector<32x32xf32>, vector<32x64xf32>, vector<32x64xf32> -> vector<32x64xf32>
    %4 = vector.broadcast %2 : vector<1x64xf32> to vector<32x64xf32>
    %5 = arith.addf %3, %4 : vector<32x64xf32>
    %6 = math.tanh %5 : vector<32x64xf32>
    %c0_5 = arith.constant 0 : index
    %c0_6 = arith.constant 0 : index
    %7 = vector.load %arg4[%c0_5, %c0_6] : memref<64x128xf32, #tpu.memory_space<vmem>>, vector<64x128xf32>
    %c0_7 = arith.constant 0 : index
    %c0_8 = arith.constant 0 : index
    %8 = vector.load %arg5[%c0_7, %c0_8] : memref<1x128xf32, #tpu.memory_space<vmem>>, vector<1x128xf32>
    %cst_9 = arith.constant dense<0.000000e+00> : vector<32x128xf32>
    %9 = tpu.matmul %6, %7, %cst_9 {dimension_numbers = #tpu.dot_dimension_numbers<[1], [0], [0], [1], [0, 0, 1, 1], [], []>} : vector<32x64xf32>, vector<64x128xf32>, vector<32x128xf32> -> vector<32x128xf32>
    %10 = vector.broadcast %8 : vector<1x128xf32> to vector<32x128xf32>
    %11 = arith.addf %9, %10 : vector<32x128xf32>
    %c0_10 = arith.constant 0 : index
    %c0_11 = arith.constant 0 : index
    %12 = vector.load %arg6[%c0_10, %c0_11] : memref<32x128xf32, #tpu.memory_space<vmem>>, vector<32x128xf32>
    tpu.vector_store %arg6[%c0_10, %c0_11], %11 {strides = array<i32>} : memref<32x128xf32, #tpu.memory_space<vmem>>, vector<32x128xf32>,
    return
  }
  func.func @transform_0(%arg0: i32) -> (i32, i32) {
    %c0_i32 = arith.constant 0 : i32
    %c0_i32_0 = arith.constant 0 : i32
    return %arg0, %c0_i32 : i32, i32
  }
  func.func @transform_1(%arg0: i32) -> (i32, i32) {
    %c0_i32 = arith.constant 0 : i32
    %c0_i32_0 = arith.constant 0 : i32
    %c0_i32_1 = arith.constant 0 : i32
    return %c0_i32, %c0_i32_0 : i32, i32
  }
  func.func @transform_2(%arg0: i32) -> (i32, i32) {
    %c0_i32 = arith.constant 0 : i32
    %c0_i32_0 = arith.constant 0 : i32
    %c0_i32_1 = arith.constant 0 : i32
    return %c0_i32, %c0_i32_0 : i32, i32
  }
  func.func @transform_3(%arg0: i32) -> (i32, i32) {
    %c0_i32 = arith.constant 0 : i32
    %c0_i32_0 = arith.constant 0 : i32
    %c0_i32_1 = arith.constant 0 : i32
    return %c0_i32, %c0_i32_0 : i32, i32
  }
  func.func @transform_4(%arg0: i32) -> (i32, i32) {
    %c0_i32 = arith.constant 0 : i32
    %c0_i32_0 = arith.constant 0 : i32
    %c0_i32_1 = arith.constant 0 : i32
    return %c0_i32, %c0_i32_0 : i32, i32
  }
  func.func @transform_5(%arg0: i32) -> (i32, i32) {
    %c0_i32 = arith.constant 0 : i32
    %c0_i32_0 = arith.constant 0 : i32
    return %arg0, %c0_i32 : i32, i32
  }
}

</mosaic_0001>

<bundles_post_ra>
// kernel: tpu_custom_call.1
= control target key start
LH: loop header
LB: loop body
LE: loop exit
PB: predicated region body
PF: predicated region fallthrough
CT: control target
= control target key end

     0   :  { %10 = vsyncpa [#allocation3], 0  ;;  %s625_s0 = inlined_call_operand.hbm [shape: f32[32,32], index: 0, kind: input, shape index: {}]   ;;  %s626_s1 = inlined_call_operand.hbm [shape: f32[32,64], index: 1, kind: input, shape index: {}]   ;;  %s627_s2 = inlined_call_operand.vmem [shape: f32[1,64], index: 2, kind: input, shape index: {}]   ;;  %s628_s3 = inlined_call_operand.hbm [shape: f32[64,128], index: 3, kind: input, shape index: {}]   ;;  %s629_s4 = inlined_call_operand.vmem [shape: f32[1,128], index: 4, kind: input, shape index: {}]   ;;  %s630_s5 = inlined_call_operand.hbm [shape: f32[32,128], index: 5, kind: output, shape index: {}]  }
   0x1   :  { %11 = vsyncpa [#allocation6], 0 }
   0x2   :  { %12 = vsyncpa [#allocation4], 0  ;;  %s512_s18 = smov [#allocation5]   ;;  %s513_s20 = smov [#allocation2]  }
   0x3   :  { %s30_s19 = sshll.u32 %s512_s18, 4  ;;  %s18_s21 = sshll.u32 %s513_s20, 4  ;;  %s31_s19 = int_to_ptr.vmem [resolvable:$true] %s30_s19  ;;  %s548_s21 = int_to_ptr.vmem [resolvable:$true] %s18_s21 }
   0x4   :  { %s418_s24 = scalar_lea.hbm %s626_s1, 512 }
   0x5   :  { %p419_p0 = scmp.ne.s32.totalorder %s626_s1, %s418_s24  ;;  %p422_p1 = scmp.lt.u32.totalorder %s418_s24, %s626_s1 }
   0x7   :  { %p424_p2 = pnand %p422_p1, %p419_p0 }
   0x9   :  { %427 = shalt.err (!%p424_p2)
}
   0xa   :  { %s428_s29 = scalar_lea.vmem %s31_s19, 512  ;;  %p433_p4 = scmp.lt.s32.totalorder %s31_s19, %s31_s19 }
   0xb   :  { %p429_p3 = scmp.ne.s32.totalorder %s31_s19, %s428_s29  ;;  %p434_p5 = scmp.lt.s32.totalorder %s428_s29, %s428_s29 }
   0xd   :  { %p435_p6 = por %p434_p5, %p433_p4 }
   0xf   :  { %p436_p7 = pnand %p435_p6, %p429_p3 }
  0x11   :  { %439 = shalt.err (!%p436_p7)
}
  0x12   :  { %s514_s30 = smov 128   ;;  %s515_s6 = smov 8  }
  0x13   :  { %36 = dma.hbm_to_vmem [thread:$0]  %s626_s1, 512, %s31_s19, [#allocation6], %s514_s30, %s514_s30, %s515_s6  }
  0x14   :  { %s440_s11 = scalar_lea.hbm %s625_s0, 512 }
  0x15   :  { %p441_p8 = scmp.ne.s32.totalorder %s625_s0, %s440_s11  ;;  %p444_p9 = scmp.lt.u32.totalorder %s440_s11, %s625_s0 }
  0x17   :  { %p446_p10 = pnand %p444_p9, %p441_p8 }
  0x19   :  { %449 = shalt.err (!%p446_p10)
}
  0x1a   :  { %s450_s16 = scalar_lea.vmem %s548_s21, 512  ;;  %p455_p12 = scmp.lt.s32.totalorder %s548_s21, %s548_s21 }
  0x1b   :  { %p451_p11 = scmp.ne.s32.totalorder %s548_s21, %s450_s16  ;;  %p456_p13 = scmp.lt.s32.totalorder %s450_s16, %s450_s16 }
  0x1d   :  { %p457_p0 = por %p456_p13, %p455_p12 }
  0x1f   :  { %p458_p1 = pnand %p457_p0, %p451_p11 }
  0x21   :  { %461 = shalt.err (!%p458_p1)
}
  0x22   :  { %24 = dma.hbm_to_vmem [thread:$0]  %s625_s0, 512, %s548_s21, [#allocation3], %s514_s30, %s514_s30, %s515_s6  }
  0x23   :  { %s516_s18 = smov [#allocation7]   ;;  %s462_s23 = scalar_lea.hbm %s628_s3, 1024 }
  0x24   :  { %s44_s19 = sshll.u32 %s516_s18, 4  ;;  %p463_p2 = scmp.ne.s32.totalorder %s628_s3, %s462_s23  ;;  %s45_s19 = int_to_ptr.vmem [resolvable:$true] %s44_s19 }
  0x25   :  { %p466_p3 = scmp.lt.u32.totalorder %s462_s23, %s628_s3 }
  0x27   :  { %p468_p4 = pnand %p466_p3, %p463_p2 }
  0x29   :  { %471 = shalt.err (!%p468_p4)
}
  0x2a   :  { %s472_s28 = scalar_lea.vmem %s45_s19, 1024  ;;  %p477_p6 = scmp.lt.s32.totalorder %s45_s19, %s45_s19 }
  0x2b   :  { %p473_p5 = scmp.ne.s32.totalorder %s45_s19, %s472_s28  ;;  %p478_p7 = scmp.lt.s32.totalorder %s472_s28, %s472_s28 }
  0x2d   :  { %p479_p8 = por %p478_p7, %p477_p6 }
  0x2f   :  { %p480_p9 = pnand %p479_p8, %p473_p5 }
  0x31   :  { %483 = shalt.err (!%p480_p9)
}
  0x32   :  { %50 = dma.hbm_to_vmem [thread:$0]  %s628_s3, 1024, %s45_s19, [#allocation6], %s514_s30, %s514_s30, %s515_s6  }
  0x33   :  { %506 = dma.done.wait [#allocation3], 512  }
  0x34   :  { %507 = vsyncadd [#allocation3], 4294966784 }
  0x35   :  { %508 = dma.done.wait [#allocation6], 1536  }
  0x36   :  { %509 = vsyncadd [#allocation6], 4294965760  ;;  %vm77_vm0 = vcmask 261120   ;;  %v66_v0 = vld [vmem:[#allocation5] sm:$0xff]  ;;  %v67_v1 = vld [vmem:[#allocation5 + $0x8] sm:$0xff]  ;;  %vm194_vm1 = vcmask 523264  }
  0x37   :  { %v68_v2 = vld [vmem:[#allocation5 + $0x10] sm:$0xff]  ;;  %v380_v3 = vpack.c.bf16 %v67_v1, %v66_v0  ;;  %v69_v4 = vld [vmem:[#allocation5 + $0x18] sm:$0xff]  ;;  %v62_v5 = vld [vmem:[#allocation2] sm:$0xff]  ;;  %s517_s8 = smov [#allocation8]  }
  0x38   :  { %v384_v6 = vpack.c.bf16 %v69_v4, %v68_v2  ;;  %352 = vmatprep.mubr.msk.f32.mxu0 %vm77_vm0, %v62_v5  ;;  %v63_v7 = vld [vmem:[#allocation2 + $0x8] sm:$0xff]  ;;  %v64_v8 = vld [vmem:[#allocation2 + $0x10] sm:$0xff]  ;;  %v65_v9 = vld [vmem:[#allocation2 + $0x18] sm:$0xff]  ;;  %s301_s9 = sshll.u32 %s517_s8, 4  ;;  %s302_s9 = int_to_ptr.vmem [resolvable:$true] %s301_s9 }
  0x39   :  { %381 = vmatprep.subr.bf16.mxu0 %v380_v3  ;;  %v179_v10 = vld [vmem:[#allocation7] sm:$0xff]  ;;  %v180_v11 = vld [vmem:[#allocation7 + $0x8] sm:$0xff]  ;;  %v181_v13 = vld [vmem:[#allocation7 + $0x10] sm:$0xff]  ;;  %s484_s10 = scalar_lea.vmem %s302_s9, 512  ;;  %p489_p11 = scmp.lt.s32.totalorder %s302_s9, %s302_s9 }
  0x3a   :  { %383 = vmatpush3.bf16.msra.mxu0 %v380_v3  ;;  %v388_v12 = vpack.c.bf16 %v180_v11, %v179_v10  ;;  %v182_v14 = vld [vmem:[#allocation7 + $0x18] sm:$0xff]  ;;  %v183_v16 = vld [vmem:[#allocation7 + $0x20] sm:$0xff]  ;;  %v184_v17 = vld [vmem:[#allocation7 + $0x28] sm:$0xff]  ;;  %p485_p10 = scmp.ne.s32.totalorder %s302_s9, %s484_s10  ;;  %p490_p12 = scmp.lt.s32.totalorder %s484_s10, %s484_s10 }
  0x3b   :  { %385 = vmatprep.subr.bf16.mxu0 %v384_v6  ;;  %v392_v15 = vpack.c.bf16 %v182_v14, %v181_v13  ;;  %v396_v18 = vpack.c.bf16 %v184_v17, %v183_v16  ;;  %v185_v19 = vld [vmem:[#allocation7 + $0x30] sm:$0xff]  ;;  %v186_v20 = vld [vmem:[#allocation7 + $0x38] sm:$0xff]  ;;  %v314_v22 = vld [vmem:[%s627_s2] ss:$0 sm:$0xff] }
  0x3c   :  { %389 = vmatprep.subr.bf16.mxu1 %v388_v12  ;;  %v400_v21 = vpack.c.bf16 %v186_v20, %v185_v19  ;;  %v319_v35 = vld [vmem:[%s629_s4] ss:$0 sm:$0xff]  ;;  %p491_p13 = por %p490_p12, %p489_p11 }
  0x3d   :  { %391 = vmatpush3.bf16.msra.mxu1 %v388_v12 }
  0x3e   :  { %387 = vmatpush3.bf16.msra.mxu0 %v384_v6  ;;  %393 = vmatprep.subr.bf16.mxu1 %v392_v15  ;;  %p492_p0 = pnand %p491_p13, %p485_p10 }
  0x41   :  { %353 = vmatmul.mubr.msk.f32.vlgmr.msra.gmra.mrb[0].mxu0 %vm77_vm0, %v63_v7  ;;  %395 = vmatpush3.bf16.msra.mxu1 %v392_v15 }
  0x42   :  { %355 = vmatprep.mubr.msk.f32.mxu0 %vm77_vm0, %v64_v8  ;;  %397 = vmatprep.subr.bf16.mxu1 %v396_v18 }
  0x45   :  { %356 = vmatmul.mubr.msk.f32.gmra.mrb[2].mxu0 %vm77_vm0, %v65_v9  ;;  %399 = vmatpush3.bf16.msra.mxu1 %v396_v18 }
  0x46   :  { %401 = vmatprep.subr.bf16.mxu1 %v400_v21 }
  0x49   :  { %403 = vmatpush3.bf16.msra.mxu1 %v400_v21 }
 0x114   :  { %v354_v23 = vpop.f32.mrb[0].mxu0 }
 0x115   :  { %v162_v24 = vadd.f32 %v354_v23, %v314_v22  ;;  %v156_v25 = vpop.f32.mrb[1].mxu0 }
 0x116   :  { %v157_v26 = vadd.f32 %v314_v22, %v156_v25 }
 0x118   :  { %410 = vtanh.f32 %v157_v26  ;;  %v357_v27 = vpop.f32.mrb[2].mxu0 }
 0x119   :  { %412 = vtanh.f32 %v162_v24  ;;  %v172_v28 = vadd.f32 %v357_v27, %v314_v22  ;;  %v166_v29 = vpop.f32.mrb[3].mxu0 }
 0x11a   :  { %v167_v30 = vadd.f32 %v314_v22, %v166_v29 }
 0x11c   :  { %414 = vtanh.f32 %v167_v30 }
 0x11d   :  { %416 = vtanh.f32 %v172_v28 }
 0x122   :  { %v411_v31 = vpop.eup %410 }
 0x123   :  { %v413_v32 = vpop.eup %412  ;;  %374 = vmatprep.mubr.msk.f32.mxu1 %vm194_vm1, %v411_v31 }
 0x124   :  { %375 = vmatmul.mubr.msk.f32.vlgmr.msra.gmra.mrb[0].mxu1 %vm194_vm1, %v413_v32 }
 0x126   :  { %v415_v33 = vpop.eup %414 }
 0x127   :  { %v417_v34 = vpop.eup %416  ;;  %377 = vmatprep.mubr.msk.f32.mxu1 %vm194_vm1, %v415_v33 }
 0x128   :  { %378 = vmatmul.mubr.msk.f32.gmra.mrb[2].mxu1 %vm194_vm1, %v417_v34 }
 0x1f7   :  { %v376_v36 = vpop.f32.mrb[0].mxu1 }
 0x1f8   :  { %v279_v37 = vadd.f32 %v376_v36, %v319_v35  ;;  %v273_v38 = vpop.f32.mrb[1].mxu1 }
 0x1f9   :  { %v274_v39 = vadd.f32 %v319_v35, %v273_v38 }
 0x1fa   :  { %293 = vst [vmem:[#allocation8 + $0x8] sm:$0xff] %v279_v37 }
 0x1fb   :  { %292 = vst [vmem:[#allocation8] sm:$0xff] %v274_v39  ;;  %v379_v40 = vpop.f32.mrb[2].mxu1 }
 0x1fc   :  { %v289_v41 = vadd.f32 %v379_v40, %v319_v35  ;;  %v283_v42 = vpop.f32.mrb[3].mxu1 }
 0x1fd   :  { %v284_v43 = vadd.f32 %v319_v35, %v283_v42 }
 0x1fe   :  { %295 = vst [vmem:[#allocation8 + $0x18] sm:$0xff] %v289_v41 }
 0x1ff   :  { %294 = vst [vmem:[#allocation8 + $0x10] sm:$0xff] %v284_v43 }
 0x200   :  { %495 = shalt.err (!%p492_p0)
}
 0x201   :  { %s496_s12 = scalar_lea.hbm %s630_s5, 512 }
 0x202   :  { %p497_p1 = scmp.ne.s32.totalorder %s630_s5, %s496_s12  ;;  %p500_p2 = scmp.lt.u32.totalorder %s496_s12, %s630_s5 }
 0x204   :  { %p502_p3 = pnand %p500_p2, %p497_p1 }
 0x206   :  { %505 = shalt.err (!%p502_p3)
}
 0x207   :  { %307 = dma.vmem_to_hbm [thread:$0]  %s302_s9, 512, %s630_s5, [#allocation4], %s514_s30, %s514_s30, %s515_s6  }
 0x208   :  { %510 = dma.done.wait [#allocation4], 512  }
 0x209   :  { %511 = vsyncadd [#allocation4], 4294966784 }
 0x20a   :  { %311 = vsyncpa [#allocation3], 1 }
 0x20b   :  { %312 = vsyncpa [#allocation6], 1 }
 0x20c   :  { %313 = vsyncpa [#allocation4], 1 }

</bundles_post_ra>
